<compile_context>
chip_gen: v5e
topology: v5e:2x2
jax: 0.10.0
libtpu: 0.0.40
codegen_flags: <defaults>
</compile_context>

<pallas_src>
import functools

import jax
import jax.numpy as jnp
from jax.experimental import pallas as pl
from jax.experimental.pallas import tpu as pltpu


# ----------------------------------------------------------------- projections

def _linear_bias_kernel(x_ref, w_ref, b_ref, o_ref):
    y = jnp.dot(x_ref[...], w_ref[...], preferred_element_type=jnp.float32)
    o_ref[...] = (y + b_ref[...]).astype(o_ref.dtype)


def _linear_nobias_kernel(x_ref, w_ref, o_ref):
    y = jnp.dot(x_ref[...], w_ref[...], preferred_element_type=jnp.float32)
    o_ref[...] = y.astype(o_ref.dtype)


def _row_tile(rows):
    # Small problems: single full block (block == full array dims is always legal).
    # Large problems: 512-row tiles (multiple of 256 for full MXU panels, sized
    # conservatively for v7x's 64 MiB VMEM with double-buffered x and out).
    return rows if rows <= 512 else 512


def pallas_linear(x2, w, b=None):
    """y = x2 @ w (+ b).  x2: (rows, K), w: (K, N), b: (N,) or None."""
    rows, k = x2.shape
    n = w.shape[1]
    tm = _row_tile(rows)
    grid = (pl.cdiv(rows, tm),)

    in_specs = [
        pl.BlockSpec((tm, k), lambda i: (i, 0)),   # x: row-tiled, pipelined
        pl.BlockSpec((k, n), lambda i: (0, 0)),    # W: VMEM-resident across the grid
    ]
    args = [x2, w]
    if b is not None:
        in_specs.append(pl.BlockSpec((1, n), lambda i: (0, 0)))
        args.append(b.reshape(1, n))
        kernel = _linear_bias_kernel
    else:
        kernel = _linear_nobias_kernel

    return pl.pallas_call(
        kernel,
        out_shape=jax.ShapeDtypeStruct((rows, n), x2.dtype),
        grid_spec=pltpu.PrefetchScalarGridSpec(
            num_scalar_prefetch=0,
            grid=grid,
            in_specs=in_specs,
            out_specs=pl.BlockSpec((tm, n), lambda i: (i, 0)),
        ),
        compiler_params=pltpu.CompilerParams(
            dimension_semantics=("parallel",)),
    )(*args)


# -------------------------------------------------------------- attention core

def _attention_core_kernel(q_ref, k_ref, v_ref, o_ref, *, scale):
    # One (batch*head) slice per grid step; blocks are (1, N, Dh).
    q = q_ref[0]
    k = k_ref[0]
    v = v_ref[0]
    # scores = q @ k^T * scale  (contract the head dim, no explicit transpose)
    s = jnp.einsum("nd,md->nm", q, k, preferred_element_type=jnp.float32) * scale
    # numerically stable softmax over keys
    s = s - jnp.max(s, axis=-1, keepdims=True)
    p = jnp.exp(s)
    attn = p / jnp.sum(p, axis=-1, keepdims=True)
    o = jnp.einsum("nm,md->nd", attn.astype(v.dtype), v,
                   preferred_element_type=jnp.float32)
    o_ref[0] = o.astype(o_ref.dtype)


def pallas_attention_core(q, k, v, scale):
    """softmax(q k^T * scale) v computed per (batch*head).  q/k/v: (BH, N, Dh)."""
    bh, n, dh = q.shape
    kernel = functools.partial(_attention_core_kernel, scale=scale)
    spec = pl.BlockSpec((1, n, dh), lambda i: (i, 0, 0))
    return pl.pallas_call(
        kernel,
        out_shape=jax.ShapeDtypeStruct((bh, n, dh), q.dtype),
        grid_spec=pltpu.PrefetchScalarGridSpec(
            num_scalar_prefetch=0,
            grid=(bh,),
            in_specs=[spec, spec, spec],
            out_specs=spec,
        ),
        input_output_aliases={0: 0},   # reuse q's HBM buffer for the output
        compiler_params=pltpu.CompilerParams(
            dimension_semantics=("parallel",)),
    )(q, k, v)


# --------------------------------------------------------------------- forward

def vit_attention(x, w_qkv, w_out, b_out, *, heads, dim_head):
    """Attention.forward(x, mask=None) with dropout p=0.0 (identity)."""
    B, N, dim = x.shape
    inner = heads * dim_head
    scale = dim_head ** -0.5
    rows = B * N

    # to_qkv (no bias)
    qkv = pallas_linear(x.reshape(rows, dim), w_qkv)            # (rows, 3*inner)

    # chunk(3, dim=-1) + rearrange 'b n (h d) -> (b h) n d'
    qkv = qkv.reshape(B, N, 3, heads, dim_head)
    qkv = jnp.transpose(qkv, (2, 0, 3, 1, 4))                   # (3, B, H, N, Dh)
    q = qkv[0].reshape(B * heads, N, dim_head)
    k = qkv[1].reshape(B * heads, N, dim_head)
    v = qkv[2].reshape(B * heads, N, dim_head)

    # TODO(synk): optional boolean `mask` path of Attention.forward not implemented.
    o = pallas_attention_core(q, k, v, scale)                   # (BH, N, Dh)

    # rearrange '(b h) n d -> b n (h d)'
    o = o.reshape(B, heads, N, dim_head)
    o = jnp.transpose(o, (0, 2, 1, 3)).reshape(rows, inner)

    # to_out = Linear(inner, dim) + Dropout(p=0.0) (identity in forward)
    out = pallas_linear(o, w_out, b_out)                        # (rows, dim)
    return out.reshape(B, N, dim)


# ------------------------------------------------------------------- reference

def reference_attention(x, w_qkv, w_out, b_out, *, heads, dim_head):
    B, N, dim = x.shape
    inner = heads * dim_head
    scale = dim_head ** -0.5
    qkv = jnp.einsum("bnd,de->bne", x, w_qkv)
    q, k, v = jnp.split(qkv, 3, axis=-1)

    def split_heads(t):
        return t.reshape(B, N, heads, dim_head).transpose(0, 2, 1, 3)

    q, k, v = map(split_heads, (q, k, v))
    dots = jnp.einsum("bhid,bhjd->bhij", q, k) * scale
    attn = jax.nn.softmax(dots, axis=-1)
    o = jnp.einsum("bhij,bhjd->bhid", attn, v)
    o = o.transpose(0, 2, 1, 3).reshape(B, N, inner)
    return jnp.einsum("bne,ed->bnd", o, w_out) + b_out


if __name__ == "__main__":
    # Small ViT-ish shapes: batch=2, seq=8, dim=32, heads=4, dim_head=8.
    B, N, dim = 2, 8, 32
    heads, dim_head = 4, 8
    inner = heads * dim_head

    key = jax.random.PRNGKey(0)
    kx, kqkv, kout, kb = jax.random.split(key, 4)

    x = jax.random.normal(kx, (B, N, dim), dtype=jnp.float32)
    # Deterministic synthetic parameters (stored in (in, out) layout: y = x @ W + b).
    w_qkv = jax.random.normal(kqkv, (dim, inner * 3), dtype=jnp.float32) * 0.05
    w_out = jax.random.normal(kout, (inner, dim), dtype=jnp.float32) * 0.05
    b_out = jax.random.normal(kb, (dim,), dtype=jnp.float32) * 0.05

    out = vit_attention(x, w_qkv, w_out, b_out, heads=heads, dim_head=dim_head)
    jax.block_until_ready(out)

    ref = reference_attention(x, w_qkv, w_out, b_out, heads=heads, dim_head=dim_head)
    assert out.shape == (B, N, dim) and out.dtype == x.dtype
    assert jnp.allclose(out, ref, atol=1e-4, rtol=1e-4), "mismatch vs reference"

    print("KERNEL_OK")
</pallas_src>

<mosaic_0001>
module attributes {stable_mosaic.version = 11 : i64} {
  func.func @_linear_nobias_kernel(%arg0: i32, %arg1: memref<16x32xf32, #tpu.memory_space<vmem>>, %arg2: memref<32x96xf32, #tpu.memory_space<vmem>>, %arg3: memref<16x96xf32, #tpu.memory_space<vmem>>) attributes {dimension_semantics = [#tpu.dimension_semantics<parallel>], iteration_bounds = array<i64: 1>, scalar_prefetch = 0 : i64, scratch_operands = 0 : i64, tpu.core_type = #tpu.core_type<tc>, window_params = [{transform_indices = @transform_0, window_bounds = array<i64: 16, 32>}, {pipeline_mode = #tpu.pipeline_mode<synchronous>, transform_indices = @transform_1, window_bounds = array<i64: 32, 96>}, {transform_indices = @transform_2, window_bounds = array<i64: 16, 96>}]} {
    %c0 = arith.constant 0 : index
    %c0_0 = arith.constant 0 : index
    %0 = vector.load %arg1[%c0, %c0_0] : memref<16x32xf32, #tpu.memory_space<vmem>>, vector<16x32xf32>
    %c0_1 = arith.constant 0 : index
    %c0_2 = arith.constant 0 : index
    %1 = vector.load %arg2[%c0_1, %c0_2] : memref<32x96xf32, #tpu.memory_space<vmem>>, vector<32x96xf32>
    %cst = arith.constant dense<0.000000e+00> : vector<16x96xf32>
    %2 = tpu.matmul %0, %1, %cst {dimension_numbers = #tpu.dot_dimension_numbers<[1], [0], [0], [1], [0, 0, 1, 1], [], []>} : vector<16x32xf32>, vector<32x96xf32>, vector<16x96xf32> -> vector<16x96xf32>
    %c0_3 = arith.constant 0 : index
    %c0_4 = arith.constant 0 : index
    %3 = vector.load %arg3[%c0_3, %c0_4] : memref<16x96xf32, #tpu.memory_space<vmem>>, vector<16x96xf32>
    tpu.vector_store %arg3[%c0_3, %c0_4], %2 {strides = array<i32>} : memref<16x96xf32, #tpu.memory_space<vmem>>, vector<16x96xf32>,
    return
  }
  func.func @transform_0(%arg0: i32) -> (i32, i32) {
    %c0_i32 = arith.constant 0 : i32
    %c0_i32_0 = arith.constant 0 : i32
    return %arg0, %c0_i32 : i32, i32
  }
  func.func @transform_1(%arg0: i32) -> (i32, i32) {
    %c0_i32 = arith.constant 0 : i32
    %c0_i32_0 = arith.constant 0 : i32
    %c0_i32_1 = arith.constant 0 : i32
    return %c0_i32, %c0_i32_0 : i32, i32
  }
  func.func @transform_2(%arg0: i32) -> (i32, i32) {
    %c0_i32 = arith.constant 0 : i32
    %c0_i32_0 = arith.constant 0 : i32
    return %arg0, %c0_i32 : i32, i32
  }
}

</mosaic_0001>

<bundles_post_ra>
// kernel: tpu_custom_call.1
= control target key start
LH: loop header
LB: loop body
LE: loop exit
PB: predicated region body
PF: predicated region fallthrough
CT: control target
= control target key end

     0   :  { %7 = vsyncpa [#allocation3], 0  ;;  %s230_s0 = inlined_call_operand.hbm [shape: f32[16,32], index: 0, kind: input, shape index: {}]   ;;  %s231_s1 = inlined_call_operand.hbm [shape: f32[32,96], index: 1, kind: input, shape index: {}]   ;;  %s232_s2 = inlined_call_operand.hbm [shape: f32[16,96], index: 2, kind: output, shape index: {}]  }
   0x1   :  { %8 = vsyncpa [#allocation6], 0 }
   0x2   :  { %9 = vsyncpa [#allocation4], 0  ;;  %s14_s11 = sshll.u32 %s230_s0, 4  ;;  %s192_s12 = smov [#allocation2]   ;;  %s15_s11 = int_to_ptr.hbm [resolvable:$true] %s14_s11 }
   0x3   :  { %s16_s13 = sshll.u32 %s192_s12, 4  ;;  %s27_s16 = sshll.u32 %s231_s1, 4  ;;  %s17_s13 = int_to_ptr.vmem [resolvable:$true] %s16_s13  ;;  %s28_s16 = int_to_ptr.hbm [resolvable:$true] %s27_s16 }
   0x4   :  { %s193_s17 = smov 128   ;;  %s194_s18 = smov 8  }
   0x5   :  { %22 = dma.hbm_to_vmem [thread:$0]  %s15_s11, 256, %s17_s13, [#allocation3], %s193_s17, %s193_s17, %s194_s18  }
   0x6   :  { %s195_s19 = smov [#allocation5]  }
   0x7   :  { %s29_s20 = sshll.u32 %s195_s19, 4  ;;  %s30_s20 = int_to_ptr.vmem [resolvable:$true] %s29_s20 }
   0x8   :  { %35 = dma.hbm_to_vmem [thread:$0]  %s28_s16, 512, %s30_s20, [#allocation6], %s193_s17, %s193_s17, %s194_s18  }
   0x9   :  { %186 = dma.done.wait [#allocation3], 256  }
   0xa   :  { %187 = vsyncadd [#allocation3], 4294967040 }
   0xb   :  { %188 = dma.done.wait [#allocation6], 512  }
   0xc   :  { %189 = vsyncadd [#allocation6], 4294966784  ;;  %v49_v0 = vld [vmem:[#allocation5 + $0x18] sm:$0xff]  ;;  %v48_v1 = vld [vmem:[#allocation5 + $0x10] sm:$0xff]  ;;  %vm50_vm0 = vcmask 261120   ;;  %s196_s0 = smov [#allocation7]  }
   0xd   :  { %69 = vmatpush.msra.mxu0 %v49_v0  ;;  %105 = vmatpush.msra.mxu1 %v49_v0  ;;  %v47_v2 = vld [vmem:[#allocation5 + $0x8] sm:$0xff]  ;;  %v46_v3 = vld [vmem:[#allocation5] sm:$0xff]  ;;  %v44_v4 = vld [vmem:[#allocation2] sm:$0xff]  ;;  %s87_s1 = sshll.u32 %s196_s0, 4  ;;  %s89_s23 = sshll.u32 %s232_s2, 4  ;;  %vm80_vm1 = vcmask 785408   ;;  %s88_s1 = int_to_ptr.vmem [resolvable:$true] %s87_s1  ;;  %s90_s23 = int_to_ptr.hbm [resolvable:$true] %s89_s23 }
   0xe   :  { %v45_v5 = vld [vmem:[#allocation2 + $0x8] sm:$0xff] }
   0xf   :  { %70 = vmatpush.msra.mxu0 %v48_v1  ;;  %106 = vmatpush.msra.mxu1 %v48_v1 }
  0x11   :  { %71 = vmatpush.msra.mxu0 %v47_v2  ;;  %107 = vmatpush.msra.mxu1 %v47_v2 }
  0x13   :  { %72 = vmatpush.msra.mxu0 %v46_v3  ;;  %108 = vmatpush.msra.mxu1 %v46_v3 }
  0x14   :  { %103 = vmatmul.msk.f32.vlgmr.msra.gmra.mxu0 %vm50_vm0, %v44_v4  ;;  %104 = vmatmul.msk.f32.vlgmr.msra.gmra.mxu1 %vm50_vm0, %v45_v5 }
  0x91   :  { %v74_v6 = vpop.f32.mrf.mxu0  ;;  %v77_v7 = vpop.f32.mrf.mxu1 }
  0x92   :  { %81 = vst.msk [vmem:[#allocation7] sm:$0xff] %vm80_vm1, %v74_v6 }
  0x93   :  { %82 = vst.msk [vmem:[#allocation7 + $0x8] sm:$0xff] %vm80_vm1, %v77_v7 }
  0x94   :  { %95 = dma.vmem_to_hbm [thread:$0]  %s88_s1, 256, %s90_s23, [#allocation4], %s193_s17, %s193_s17, %s194_s18  }
  0x95   :  { %190 = dma.done.wait [#allocation4], 256  }
  0x96   :  { %191 = vsyncadd [#allocation4], 4294967040 }
  0x97   :  { %100 = vsyncpa [#allocation3], 1 }
  0x98   :  { %101 = vsyncpa [#allocation6], 1 }
  0x99   :  { %102 = vsyncpa [#allocation4], 1 }

</bundles_post_ra>
